<compile_context>
chip_gen: v7x
topology: tpu7x:2x2x1
jax: 0.10.0
libtpu: 0.0.40
codegen_flags: <defaults>
</compile_context>

<pallas_src>
import jax
import jax.numpy as jnp
from jax.experimental import pallas as pl
from jax.experimental.pallas import tpu as pltpu


def _round_up(x, m):
    return ((x + m - 1) // m) * m


def _make_dtild_kernel(n_inputs):
    """Kernel: o = relu(sum_i x_i @ w_i + b), split-K over the variadic inputs."""

    def kernel(*refs):
        x_refs = refs[:n_inputs]                    # each (tm, F_i)   compute dtype
        w_refs = refs[n_inputs:2 * n_inputs]        # each (F_i, N)    compute dtype
        b_ref = refs[2 * n_inputs]                  # (1, N)           f32
        o_ref = refs[2 * n_inputs + 1]              # (tm, N)

        acc = jnp.dot(x_refs[0][...], w_refs[0][...],
                      preferred_element_type=jnp.float32)
        for xr, wr in zip(x_refs[1:], w_refs[1:]):
            acc += jnp.dot(xr[...], wr[...],
                           preferred_element_type=jnp.float32)
        acc += b_ref[...]                           # f32 epilogue
        o_ref[...] = jnp.maximum(acc, 0.0).astype(o_ref.dtype)

    return kernel


def dtild_forward(inputs, weights_t, bias2d, *, block_b=256,
                  compute_dtype=jnp.bfloat16, out_dtype=jnp.float32):
    """Pallas equivalent of Dtild.forward.

    inputs    : sequence of (B, F_i) arrays (the variadic *inputs of the module)
    weights_t : sequence of (F_i, N) arrays -- the Linear weight, pre-transposed
                and pre-split per input AT INIT TIME (no per-call transpose/concat)
    bias2d    : (1, N) bias
    returns   : (B, N) = relu(concat(inputs) @ W.T + b)
    """
    n = len(inputs)
    assert n == len(weights_t)
    B = inputs[0].shape[0]
    N = bias2d.shape[-1]
    feats = [x.shape[1] for x in inputs]

    # Batch tile: multiple of the sublane packing for the compute dtype.
    sub = 16 if compute_dtype == jnp.bfloat16 else 8
    if B > block_b:
        tm = _round_up(block_b, sub)
        B_pad = _round_up(B, tm)
    else:
        tm = _round_up(B, sub)
        B_pad = tm

    xs = []
    for x in inputs:
        x = x.astype(compute_dtype)
        if B_pad != B:
            x = jnp.pad(x, ((0, B_pad - B), (0, 0)))
        xs.append(x)
    ws = [w.astype(compute_dtype) for w in weights_t]
    b = bias2d.astype(jnp.float32)

    grid = (B_pad // tm,)

    in_specs = (
        # activations: tiled over the batch axis
        [pl.BlockSpec((tm, f), lambda i: (i, 0)) for f in feats]
        # weight slices: grid-invariant -> fetched once, VMEM-resident
        + [pl.BlockSpec((f, N), lambda i: (0, 0)) for f in feats]
        # bias: grid-invariant
        + [pl.BlockSpec((1, N), lambda i: (0, 0))]
    )
    out_specs = pl.BlockSpec((tm, N), lambda i: (i, 0))

    out = pl.pallas_call(
        _make_dtild_kernel(n),
        out_shape=jax.ShapeDtypeStruct((B_pad, N), out_dtype),
        grid=grid,
        in_specs=in_specs,
        out_specs=out_specs,
        compiler_params=pltpu.CompilerParams(
            dimension_semantics=("parallel",),      # batch tiles are independent
            vmem_limit_bytes=32 * 1024 * 1024,      # safe on v5e/v6e/v7x
        ),
    )(*xs, *ws, b)

    return out[:B] if B_pad != B else out


def init_dtild_params(key, feature_sizes, output):
    """nn.Linear(hidden+actions, output)-style init; returns both the PyTorch-layout
    params (for reference math) and the kernel parameter layout (transposed + split
    once, so no per-call transpose/concat)."""
    fan_in = sum(feature_sizes)
    bound = 1.0 / (fan_in ** 0.5)
    k_w, k_b = jax.random.split(key)
    weight = jax.random.uniform(k_w, (output, fan_in), jnp.float32, -bound, bound)
    bias = jax.random.uniform(k_b, (output,), jnp.float32, -bound, bound)

    w_t = weight.T                                   # (fan_in, output), done once
    offs, weights_t = 0, []
    for f in feature_sizes:
        weights_t.append(w_t[offs:offs + f, :])
        offs += f
    bias2d = bias.reshape(1, output)
    return weight, bias, tuple(weights_t), bias2d


if __name__ == "__main__":
    # Module hyper-params (small, consistent with the forward's semantics).
    hidden, actions, output = 32, 8, 16
    batch = 256                                     # small, but enough for 2 batch tiles

    key = jax.random.PRNGKey(0)
    k_in, k_par = jax.random.split(key)
    k_h, k_a = jax.random.split(k_in)

    weight, bias, weights_t, bias2d = init_dtild_params(k_par, (hidden, actions), output)

    # Example variadic inputs: hidden state and action features.
    h = jax.random.normal(k_h, (batch, hidden), jnp.float32)
    a = jax.random.normal(k_a, (batch, actions), jnp.float32)

    out = dtild_forward((h, a), weights_t, bias2d, block_b=128)
    out = jax.block_until_ready(out)

    # Reference with matching math: bf16-rounded inputs/weights, f32 accumulate,
    # f32 bias + ReLU (same as the kernel's MXU path).
    xb = jnp.concatenate((h, a), axis=1).astype(jnp.bfloat16).astype(jnp.float32)
    wb = weight.astype(jnp.bfloat16).astype(jnp.float32)
    ref = jnp.maximum(xb @ wb.T + bias, 0.0)

    assert out.shape == (batch, output)
    assert jnp.allclose(out, ref, atol=2e-3, rtol=2e-3)

    print("KERNEL_OK")
</pallas_src>

<mosaic_0001>
module attributes {stable_mosaic.version = 11 : i64} {
  func.func @kernel(%arg0: i32, %arg1: memref<128x32xbf16, #tpu.memory_space<vmem>>, %arg2: memref<128x8xbf16, #tpu.memory_space<vmem>>, %arg3: memref<32x16xbf16, #tpu.memory_space<vmem>>, %arg4: memref<8x16xbf16, #tpu.memory_space<vmem>>, %arg5: memref<1x16xf32, #tpu.memory_space<vmem>>, %arg6: memref<128x16xf32, #tpu.memory_space<vmem>>) attributes {dimension_semantics = [#tpu.dimension_semantics<parallel>], iteration_bounds = array<i64: 2>, scalar_prefetch = 0 : i64, scratch_operands = 0 : i64, tpu.core_type = #tpu.core_type<tc>, window_params = [{transform_indices = @transform_0, window_bounds = array<i64: 128, 32>}, {transform_indices = @transform_1, window_bounds = array<i64: 128, 8>}, {pipeline_mode = #tpu.pipeline_mode<synchronous>, transform_indices = @transform_2, window_bounds = array<i64: 32, 16>}, {pipeline_mode = #tpu.pipeline_mode<synchronous>, transform_indices = @transform_3, window_bounds = array<i64: 8, 16>}, {pipeline_mode = #tpu.pipeline_mode<synchronous>, transform_indices = @transform_4, window_bounds = array<i64: 1, 16>}, {transform_indices = @transform_5, window_bounds = array<i64: 128, 16>}]} {
    %c0 = arith.constant 0 : index
    %c0_0 = arith.constant 0 : index
    %0 = vector.load %arg1[%c0, %c0_0] : memref<128x32xbf16, #tpu.memory_space<vmem>>, vector<128x32xbf16>
    %c0_1 = arith.constant 0 : index
    %c0_2 = arith.constant 0 : index
    %1 = vector.load %arg3[%c0_1, %c0_2] : memref<32x16xbf16, #tpu.memory_space<vmem>>, vector<32x16xbf16>
    %cst = arith.constant dense<0.000000e+00> : vector<128x16xf32>
    %2 = tpu.matmul %0, %1, %cst {dimension_numbers = #tpu.dot_dimension_numbers<[1], [0], [0], [1], [0, 0, 1, 1], [], []>} : vector<128x32xbf16>, vector<32x16xbf16>, vector<128x16xf32> -> vector<128x16xf32>
    %c0_3 = arith.constant 0 : index
    %c0_4 = arith.constant 0 : index
    %3 = vector.load %arg2[%c0_3, %c0_4] : memref<128x8xbf16, #tpu.memory_space<vmem>>, vector<128x8xbf16>
    %c0_5 = arith.constant 0 : index
    %c0_6 = arith.constant 0 : index
    %4 = vector.load %arg4[%c0_5, %c0_6] : memref<8x16xbf16, #tpu.memory_space<vmem>>, vector<8x16xbf16>
    %cst_7 = arith.constant dense<0.000000e+00> : vector<128x16xf32>
    %5 = tpu.matmul %3, %4, %cst_7 {dimension_numbers = #tpu.dot_dimension_numbers<[1], [0], [0], [1], [0, 0, 1, 1], [], []>} : vector<128x8xbf16>, vector<8x16xbf16>, vector<128x16xf32> -> vector<128x16xf32>
    %6 = arith.addf %2, %5 : vector<128x16xf32>
    %c0_8 = arith.constant 0 : index
    %c0_9 = arith.constant 0 : index
    %7 = vector.load %arg5[%c0_8, %c0_9] : memref<1x16xf32, #tpu.memory_space<vmem>>, vector<1x16xf32>
    %8 = vector.broadcast %7 : vector<1x16xf32> to vector<128x16xf32>
    %9 = arith.addf %6, %8 : vector<128x16xf32>
    %cst_10 = arith.constant 0.000000e+00 : f32
    %10 = vector.broadcast %cst_10 : f32 to vector<128x16xf32>
    %11 = arith.maximumf %9, %10 : vector<128x16xf32>
    %c0_11 = arith.constant 0 : index
    %c0_12 = arith.constant 0 : index
    %12 = vector.load %arg6[%c0_11, %c0_12] : memref<128x16xf32, #tpu.memory_space<vmem>>, vector<128x16xf32>
    tpu.vector_store %arg6[%c0_11, %c0_12], %11 {strides = array<i32>} : memref<128x16xf32, #tpu.memory_space<vmem>>, vector<128x16xf32>,
    return
  }
  func.func @transform_0(%arg0: i32) -> (i32, i32) {
    %c0_i32 = arith.constant 0 : i32
    %c0_i32_0 = arith.constant 0 : i32
    return %arg0, %c0_i32 : i32, i32
  }
  func.func @transform_1(%arg0: i32) -> (i32, i32) {
    %c0_i32 = arith.constant 0 : i32
    %c0_i32_0 = arith.constant 0 : i32
    return %arg0, %c0_i32 : i32, i32
  }
  func.func @transform_2(%arg0: i32) -> (i32, i32) {
    %c0_i32 = arith.constant 0 : i32
    %c0_i32_0 = arith.constant 0 : i32
    %c0_i32_1 = arith.constant 0 : i32
    return %c0_i32, %c0_i32_0 : i32, i32
  }
  func.func @transform_3(%arg0: i32) -> (i32, i32) {
    %c0_i32 = arith.constant 0 : i32
    %c0_i32_0 = arith.constant 0 : i32
    %c0_i32_1 = arith.constant 0 : i32
    return %c0_i32, %c0_i32_0 : i32, i32
  }
  func.func @transform_4(%arg0: i32) -> (i32, i32) {
    %c0_i32 = arith.constant 0 : i32
    %c0_i32_0 = arith.constant 0 : i32
    %c0_i32_1 = arith.constant 0 : i32
    return %c0_i32, %c0_i32_0 : i32, i32
  }
  func.func @transform_5(%arg0: i32) -> (i32, i32) {
    %c0_i32 = arith.constant 0 : i32
    %c0_i32_0 = arith.constant 0 : i32
    return %arg0, %c0_i32 : i32, i32
  }
}

</mosaic_0001>

<bundles_post_ra>
// kernel: tpu_custom_call.1
= control target key start
LH: loop header
LB: loop body
LE: loop exit
PB: predicated region body
PF: predicated region fallthrough
CT: control target
= control target key end

     0   :  { %s938_s18 = smov 0   ;;  %s1062_s0 = inlined_call_operand.vmem [shape: bf16[256,32], index: 0, kind: input, shape index: {}]   ;;  %s1063_s1 = inlined_call_operand.vmem [shape: bf16[256,8], index: 1, kind: input, shape index: {}]   ;;  %s1064_s2 = inlined_call_operand.vmem [shape: bf16[32,16], index: 2, kind: input, shape index: {}]   ;;  %s1065_s3 = inlined_call_operand.vmem [shape: bf16[8,16], index: 3, kind: input, shape index: {}]   ;;  %s1066_s4 = inlined_call_operand.vmem [shape: f32[1,16], index: 4, kind: input, shape index: {}]   ;;  %s1067_s5 = inlined_call_operand.vmem [shape: f32[256,16], index: 5, kind: output, shape index: {}]  }
   0x1 LB: > { %s752_s19 = sadd.s32 4294967295, %s906_s18   ;;  %p756_p0 = scmp.ge.s32.totalorder %s906_s18, 1  ;;  %s906_s18 = sphi %s938_s18, %s15_s18  }
   0x2   : > { %p199_p1 = scmp.lt.s32.totalorder %s906_s18, 3 }
   0x4   : > { %p200_p2 = pnand %p756_p0, %p199_p1 }
   0x5   : > { %v882_v0 = vld [vmem:[%s1064_s2] sm:$0xff] (!%p200_p2)   ;;  %vm353_vm0 = vcmask (!%p200_p2), 1043456   ;;  %v883_v2 = vld [vmem:[%s1064_s2 + $0x8] sm:$0xff] (!%p200_p2)   ;;  %s757_s26 = sshll.u32 (!%p200_p2), %s752_s19, 4  ;;  %vm328_vm1 = vcmask (!%p200_p2), 64512   ;;  %vm506_vm2 = vcmask (!%p200_p2), 261120  }
   0x6   : > { %203 = sbr.rel (%p200_p2) target bundleno = 265 (0x109), region = 40  ;;  %v287_v1 = vld [vmem:[%s1065_s3] sm:$0xf] (!%p200_p2)  ;;  %837 = vmatprep.subr.bf16.mxu0 (!%p200_p2), %v882_v0  ;;  %p233_p3 = scmp.lt.s32.totalorder (!%p200_p2), %s757_s26, 31  ;;  %vm667_vm3 = vcmask (!%p200_p2), 130048  }
   0x7   : > { %873 = vmatprep.subr.msk.bf16.mxu1 (!%p200_p2), %vm353_vm0, %v287_v1  ;;  %v355_v3 = vsel (!%p200_p2), %vm353_vm0, %v287_v1, 0  ;;  %838 = vmatpush3.bf16.msra.mxu0 (!%p200_p2), %v882_v0  ;;  %v1003_v22 = vld [vmem:[%s1066_s4] ss:$0 sm:$0xff] (!%p200_p2) }
   0x8   : > { %820 = vmatpush3.bf16.msra.mxu1 (!%p200_p2), %v355_v3  ;;  %839 = vmatprep.subr.bf16.mxu0 (!%p200_p2), %v883_v2 }
   0xb   : > { %840 = vmatpush3.bf16.msra.mxu0 (!%p200_p2), %v883_v2 }
   0xd   : > { %s1069_s26 = smov (!%p233_p3, %s757_s26), 31 }
   0xe   : > { %s758_s27 = sshll.u32 %s1069_s26, 2  ;;  %s762_s11 = sshll.u32 %s1069_s26, 3 }
   0xf   : > { %s961_s30 = scalar_lea.vmem %s1063_s1, %s758_s27  ;;  %s966_s8 = scalar_lea.vmem %s1062_s0, %s758_s27 }
  0x10   : > { %v884_v4 = vld [vmem:[%s961_s30] sm:$0xff]   ;;  %v886_v6 = vld [vmem:[%s961_s30 + $0x8] sm:$0xff]   ;;  %v888_v8 = vld [vmem:[%s961_s30 + $0x10] sm:$0xff]   ;;  %s1010_s14 = scalar_lea.vmem %s1067_s5, %s762_s11 }
  0x11   : > { %v885_v5 = vld [vmem:[%s966_s8] sm:$0xff]   ;;  %821 = vmatprep.mubr.msk.bf16.mxu1 %vm328_vm1, %v884_v4  ;;  %v887_v7 = vld [vmem:[%s966_s8 + $0x8] sm:$0xff]   ;;  %v889_v9 = vld [vmem:[%s966_s8 + $0x10] sm:$0xff]  }
  0x12   : > { %841 = vmatprep.mubr.msk.bf16.mxu0 %vm506_vm2, %v885_v5  ;;  %822 = vmatmul.mubr.msk.bf16.vlgmr.msra.gmra.mrb[0].mxu1 %vm328_vm1, %v886_v6  ;;  %v890_v10 = vld [vmem:[%s961_s30 + $0x18] sm:$0xff]   ;;  %v892_v12 = vld [vmem:[%s961_s30 + $0x20] sm:$0xff]   ;;  %v894_v14 = vld [vmem:[%s961_s30 + $0x28] sm:$0xff]  }
  0x13   : > { %842 = vmatmul.mubr.msk.bf16.vlgmr.msra.gmra.mrb[0].mxu0 %vm506_vm2, %v887_v7  ;;  %825 = vmatprep.mubr.msk.bf16.mxu1 %vm328_vm1, %v888_v8  ;;  %v891_v11 = vld [vmem:[%s966_s8 + $0x18] sm:$0xff]   ;;  %v893_v13 = vld [vmem:[%s966_s8 + $0x20] sm:$0xff]   ;;  %v895_v15 = vld [vmem:[%s966_s8 + $0x28] sm:$0xff]  }
  0x14   : > { %845 = vmatprep.mubr.msk.bf16.mxu0 %vm506_vm2, %v889_v9  ;;  %v896_v16 = vld [vmem:[%s961_s30 + $0x30] sm:$0xff]   ;;  %v898_v18 = vld [vmem:[%s961_s30 + $0x38] sm:$0xff]  }
  0x15   : > { %v897_v17 = vld [vmem:[%s966_s8 + $0x30] sm:$0xff]   ;;  %v899_v19 = vld [vmem:[%s966_s8 + $0x38] sm:$0xff]  }
  0x1a   : > { %826 = vmatmul.mubr.msk.bf16.gmra.mrb[4].mxu1 %vm328_vm1, %v890_v10 }
  0x1b   : > { %846 = vmatmul.mubr.msk.bf16.gmra.mrb[4].mxu0 %vm506_vm2, %v891_v11  ;;  %829 = vmatprep.mubr.msk.bf16.mxu1 %vm328_vm1, %v892_v12 }
  0x1c   : > { %849 = vmatprep.mubr.msk.bf16.mxu0 %vm506_vm2, %v893_v13 }
  0x22   : > { %830 = vmatmul.mubr.msk.bf16.gmra.mrb[8].mxu1 %vm328_vm1, %v894_v14 }
  0x23   : > { %850 = vmatmul.mubr.msk.bf16.gmra.mrb[8].mxu0 %vm506_vm2, %v895_v15  ;;  %833 = vmatprep.mubr.msk.bf16.mxu1 %vm328_vm1, %v896_v16 }
  0x24   : > { %853 = vmatprep.mubr.msk.bf16.mxu0 %vm506_vm2, %v897_v17 }
  0x2a   : > { %834 = vmatmul.mubr.msk.bf16.gmra.mrb[12].mxu1 %vm328_vm1, %v898_v18 }
  0x2b   : > { %854 = vmatmul.mubr.msk.bf16.gmra.mrb[12].mxu0 %vm506_vm2, %v899_v19 }
  0xe5   : > { %v823_v20 = vpop.f32.mrb[0].mxu1 }
  0xe6   : > { %v843_v21 = vpop.f32.mrb[0].mxu0  ;;  %v391_v23 = vpop.f32.mrb[1].mxu1 }
  0xe7   : > { %v574_v24 = vadd.f32 %v843_v21, %v823_v20  ;;  %v565_v25 = vpop.f32.mrb[1].mxu0  ;;  %v824_v26 = vpop.f32.mrb[2].mxu1 }
  0xe8   : > { %v566_v27 = vadd.f32 %v565_v25, %v391_v23  ;;  %v844_v28 = vpop.f32.mrb[2].mxu0  ;;  %v394_v29 = vpop.f32.mrb[3].mxu1 }
  0xe9   : > { %v637_v30 = vadd.f32 %v1003_v22, %v574_v24  ;;  %v577_v31 = vadd.f32 %v844_v28, %v824_v26  ;;  %v568_v32 = vpop.f32.mrb[3].mxu0 }
  0xea   : > { %v635_v33 = vadd.f32 %v1003_v22, %v566_v27  ;;  %v569_v34 = vadd.f32 %v568_v32, %v394_v29 }
  0xeb   : > { %v653_v35 = vmax.f32 %v637_v30, 0.0  ;;  %v638_v36 = vadd.f32 %v1003_v22, %v577_v31 }
  0xec   : > { %v651_v37 = vmax.f32 %v635_v33, 0.0  ;;  %v636_v38 = vadd.f32 %v1003_v22, %v569_v34 }
  0xed   : > { %670 = vst.msk [vmem:[%s1010_s14 + $0x10] sm:$0xff] %vm667_vm3, %v653_v35  ;;  %v654_v39 = vmax.f32 %v638_v36, 0.0  ;;  %v827_v40 = vpop.f32.mrb[4].mxu1 }
  0xee   : > { %668 = vst.msk [vmem:[%s1010_s14] sm:$0xff] %vm667_vm3, %v651_v37  ;;  %v652_v41 = vmax.f32 %v636_v38, 0.0  ;;  %v847_v42 = vpop.f32.mrb[4].mxu0  ;;  %v407_v43 = vpop.f32.mrb[5].mxu1 }
  0xef   : > { %671 = vst.msk [vmem:[%s1010_s14 + $0x18] sm:$0xff] %vm667_vm3, %v654_v39  ;;  %v590_v44 = vadd.f32 %v847_v42, %v827_v40  ;;  %v581_v45 = vpop.f32.mrb[5].mxu0  ;;  %v828_v46 = vpop.f32.mrb[6].mxu1 }
  0xf0   : > { %669 = vst.msk [vmem:[%s1010_s14 + $0x8] sm:$0xff] %vm667_vm3, %v652_v41  ;;  %v582_v47 = vadd.f32 %v581_v45, %v407_v43  ;;  %v848_v48 = vpop.f32.mrb[6].mxu0  ;;  %v410_v49 = vpop.f32.mrb[7].mxu1 }
  0xf1   : > { %v641_v50 = vadd.f32 %v1003_v22, %v590_v44  ;;  %v593_v51 = vadd.f32 %v848_v48, %v828_v46  ;;  %v584_v52 = vpop.f32.mrb[7].mxu0 }
  0xf2   : > { %v639_v53 = vadd.f32 %v1003_v22, %v582_v47  ;;  %v585_v54 = vadd.f32 %v584_v52, %v410_v49 }
  0xf3   : > { %v657_v55 = vmax.f32 %v641_v50, 0.0  ;;  %v642_v56 = vadd.f32 %v1003_v22, %v593_v51 }
  0xf4   : > { %v655_v57 = vmax.f32 %v639_v53, 0.0  ;;  %v640_v58 = vadd.f32 %v1003_v22, %v585_v54 }
  0xf5   : > { %674 = vst.msk [vmem:[%s1010_s14 + $0x30] sm:$0xff] %vm667_vm3, %v657_v55  ;;  %v658_v59 = vmax.f32 %v642_v56, 0.0  ;;  %v831_v60 = vpop.f32.mrb[8].mxu1 }
  0xf6   : > { %672 = vst.msk [vmem:[%s1010_s14 + $0x20] sm:$0xff] %vm667_vm3, %v655_v57  ;;  %v656_v61 = vmax.f32 %v640_v58, 0.0  ;;  %v851_v62 = vpop.f32.mrb[8].mxu0  ;;  %v423_v63 = vpop.f32.mrb[9].mxu1 }
  0xf7   : > { %675 = vst.msk [vmem:[%s1010_s14 + $0x38] sm:$0xff] %vm667_vm3, %v658_v59  ;;  %v606_v0 = vadd.f32 %v851_v62, %v831_v60  ;;  %v597_v1 = vpop.f32.mrb[9].mxu0  ;;  %v832_v2 = vpop.f32.mrb[10].mxu1 }
  0xf8   : > { %673 = vst.msk [vmem:[%s1010_s14 + $0x28] sm:$0xff] %vm667_vm3, %v656_v61  ;;  %v598_v3 = vadd.f32 %v597_v1, %v423_v63  ;;  %v852_v4 = vpop.f32.mrb[10].mxu0  ;;  %v426_v5 = vpop.f32.mrb[11].mxu1 }
  0xf9   : > { %v645_v6 = vadd.f32 %v1003_v22, %v606_v0  ;;  %v609_v7 = vadd.f32 %v852_v4, %v832_v2  ;;  %v600_v8 = vpop.f32.mrb[11].mxu0 }
  0xfa   : > { %v643_v9 = vadd.f32 %v1003_v22, %v598_v3  ;;  %v601_v10 = vadd.f32 %v600_v8, %v426_v5 }
  0xfb   : > { %v661_v11 = vmax.f32 %v645_v6, 0.0  ;;  %v646_v12 = vadd.f32 %v1003_v22, %v609_v7 }
  0xfc   : > { %v659_v13 = vmax.f32 %v643_v9, 0.0  ;;  %v644_v14 = vadd.f32 %v1003_v22, %v601_v10 }
  0xfd   : > { %678 = vst.msk [vmem:[%s1010_s14 + $0x50] sm:$0xff] %vm667_vm3, %v661_v11  ;;  %v662_v15 = vmax.f32 %v646_v12, 0.0  ;;  %v835_v16 = vpop.f32.mrb[12].mxu1 }
  0xfe   : > { %676 = vst.msk [vmem:[%s1010_s14 + $0x40] sm:$0xff] %vm667_vm3, %v659_v13  ;;  %v660_v17 = vmax.f32 %v644_v14, 0.0  ;;  %v855_v18 = vpop.f32.mrb[12].mxu0  ;;  %v439_v19 = vpop.f32.mrb[13].mxu1 }
  0xff   : > { %679 = vst.msk [vmem:[%s1010_s14 + $0x58] sm:$0xff] %vm667_vm3, %v662_v15  ;;  %v622_v20 = vadd.f32 %v855_v18, %v835_v16  ;;  %v613_v21 = vpop.f32.mrb[13].mxu0  ;;  %v836_v23 = vpop.f32.mrb[14].mxu1 }
 0x100   : > { %677 = vst.msk [vmem:[%s1010_s14 + $0x48] sm:$0xff] %vm667_vm3, %v660_v17  ;;  %v614_v24 = vadd.f32 %v613_v21, %v439_v19  ;;  %v856_v25 = vpop.f32.mrb[14].mxu0  ;;  %v442_v26 = vpop.f32.mrb[15].mxu1 }
 0x101   : > { %v649_v27 = vadd.f32 %v1003_v22, %v622_v20  ;;  %v625_v28 = vadd.f32 %v856_v25, %v836_v23  ;;  %v616_v29 = vpop.f32.mrb[15].mxu0 }
 0x102   : > { %v647_v30 = vadd.f32 %v1003_v22, %v614_v24  ;;  %v617_v31 = vadd.f32 %v616_v29, %v442_v26 }
 0x103   : > { %v665_v32 = vmax.f32 %v649_v27, 0.0  ;;  %v650_v33 = vadd.f32 %v1003_v22, %v625_v28 }
 0x104   : > { %v663_v34 = vmax.f32 %v647_v30, 0.0  ;;  %v648_v35 = vadd.f32 %v1003_v22, %v617_v31 }
 0x105   : > { %682 = vst.msk [vmem:[%s1010_s14 + $0x70] sm:$0xff] %vm667_vm3, %v665_v32  ;;  %v666_v36 = vmax.f32 %v650_v33, 0.0 }
 0x106   : > { %680 = vst.msk [vmem:[%s1010_s14 + $0x60] sm:$0xff] %vm667_vm3, %v663_v34  ;;  %v664_v37 = vmax.f32 %v648_v35, 0.0 }
 0x107   : > { %683 = vst.msk [vmem:[%s1010_s14 + $0x78] sm:$0xff] %vm667_vm3, %v666_v36 }
 0x108   : > { %681 = vst.msk [vmem:[%s1010_s14 + $0x68] sm:$0xff] %vm667_vm3, %v664_v37 }
 0x109 PF: > { %s15_s18 = sadd.s32 1, %s906_s18  }
 0x10a   : > { %p12_p4 = scmp.ge.s32.totalorder %s15_s18, 4  }
 0x10c   :  { %14 = sbr.rel (!%p12_p4) target bundleno = 1 (0x1), region = 73 }

</bundles_post_ra>
